<compile_context>
chip_gen: v7x
topology: tpu7x:2x2x1
jax: 0.10.0
libtpu: 0.0.40
codegen_flags: <defaults>
</compile_context>

<pallas_src>
import functools

import jax
import jax.numpy as jnp
from jax.experimental import pallas as pl
from jax.experimental.pallas import tpu as pltpu


def _shortcut_conv3x3_kernel(x_ref, w_ref, b_ref, o_ref, patches_ref, *, H, W):
    # x_ref:       (1, C, H*W)   input block, spatial flattened on the lane axis
    # w_ref:       (Co, 9*C)     conv weights, laid out as (co, (kh, kw, ci))
    # b_ref:       (Co, 1)       bias
    # o_ref:       (1, Co, H*W)  output block
    # patches_ref: (9*C, H*W)    VMEM scratch holding the im2col matrix
    C, HW = x_ref.shape[1], x_ref.shape[2]

    xf = x_ref[0].astype(jnp.float32)                       # (C, HW) -- loaded once

    # Zero-pad one image row (+1 lane) on each side so every 3x3 tap becomes a
    # *static* lane-window of the same flat slab.  Taps that run off the
    # top/bottom rows land in the zero pad automatically; taps that run off the
    # left/right image edge are masked below.
    zpad = jnp.zeros((C, W + 1), dtype=jnp.float32)
    slab = jnp.concatenate([zpad, xf, zpad], axis=1)        # (C, (H+2)*W + 2)
    base = W + 1                                            # offset of x[:, 0] in slab

    # Hoisted masks for the width-edge taps (lane position -> image column).
    col = jax.lax.broadcasted_iota(jnp.int32, (C, HW), 1) % W
    mask_l = col >= 1                                       # column w-1 is in-bounds
    mask_r = col <= W - 2                                   # column w+1 is in-bounds

    # Build the (9*C, HW) im2col matrix in VMEM (keeps vreg pressure bounded).
    o = 0
    for dh in (-1, 0, 1):
        for dw in (-1, 0, 1):
            start = base + dh * W + dw
            tap = slab[:, start:start + HW]                 # (C, HW) static slice
            if dw == -1:
                tap = jnp.where(mask_l, tap, 0.0)
            elif dw == 1:
                tap = jnp.where(mask_r, tap, 0.0)
            patches_ref[o * C:(o + 1) * C, :] = tap
            o += 1

    # Single MXU matmul with K = 9*C (instead of nine K=C matmuls).
    conv = jnp.dot(w_ref[...].astype(jnp.float32), patches_ref[...],
                   preferred_element_type=jnp.float32)      # (Co, HW)

    # Fused epilogue: residual + bias + cast, one lane-dense store.
    out = xf + conv + b_ref[...].astype(jnp.float32)
    o_ref[0] = out.astype(o_ref.dtype)


def shortcut_block(x_nchw, w_oihw, b):
    """out = x + conv3x3_same(x, w, b); PyTorch NCHW / OIHW semantics."""
    N, C, H, W = x_nchw.shape
    Co = w_oihw.shape[0]
    assert Co == C, "residual add requires Cout == Cin"
    HW = H * W

    # Layout plumbing only (no extra HBM pass over the activation):
    # merging the two trailing contiguous dims is a free reshape, and the
    # weight/bias rearrangement touches just 9*C*C + C elements.
    x_flat = x_nchw.reshape(N, C, HW)
    w2 = jnp.transpose(w_oihw, (0, 2, 3, 1)).reshape(Co, 9 * C)   # (co,(kh,kw,ci))
    b2 = b.reshape(Co, 1)

    itemsize = jnp.dtype(x_nchw.dtype).itemsize
    cost = pl.CostEstimate(
        flops=2 * N * HW * 9 * C * Co,
        transcendentals=0,
        bytes_accessed=(N * C * HW + 9 * C * Co + Co + N * Co * HW) * itemsize,
    )

    out_flat = pl.pallas_call(
        functools.partial(_shortcut_conv3x3_kernel, H=H, W=W),
        out_shape=jax.ShapeDtypeStruct((N, Co, HW), x_nchw.dtype),
        grid_spec=pltpu.PrefetchScalarGridSpec(
            num_scalar_prefetch=0,
            grid=(N,),
            in_specs=[
                pl.BlockSpec((1, C, HW), lambda n: (n, 0, 0)),
                pl.BlockSpec((Co, 9 * C), lambda n: (0, 0)),
                pl.BlockSpec((Co, 1), lambda n: (0, 0)),
            ],
            out_specs=pl.BlockSpec((1, Co, HW), lambda n: (n, 0, 0)),
            scratch_shapes=[pltpu.VMEM((9 * C, HW), jnp.float32)],
        ),
        compiler_params=pltpu.CompilerParams(
            dimension_semantics=("parallel",),
        ),
        cost_estimate=cost,
    )(x_flat, w2, b2)

    # NOTE: for large activations, add an H-tiled grid axis (one-image-row halo)
    # so the per-step block stays within v7x's 64 MiB VMEM and the parallel grid
    # feeds both v7x TensorCores / deeper pipelining on v5e/v6e.
    return out_flat.reshape(N, Co, H, W)


def _reference(x_nchw, w_oihw, b):
    conv = jax.lax.conv_general_dilated(
        x_nchw, w_oihw, window_strides=(1, 1), padding="SAME",
        dimension_numbers=("NCHW", "OIHW", "NCHW"))
    return x_nchw + conv + b.reshape(1, -1, 1, 1)


if __name__ == "__main__":
    key = jax.random.PRNGKey(0)
    k_x, k_w, k_b = jax.random.split(key, 3)

    N, C, H, W = 2, 4, 16, 16
    x = jax.random.normal(k_x, (N, C, H, W), dtype=jnp.float32)
    w = jax.random.normal(k_w, (C, C, 3, 3), dtype=jnp.float32) * 0.1   # OIHW
    b = jax.random.normal(k_b, (C,), dtype=jnp.float32) * 0.1

    out = jax.block_until_ready(shortcut_block(x, w, b))
    ref = _reference(x, w, b)

    assert out.shape == (N, C, H, W)
    assert jnp.allclose(out, ref, atol=1e-4, rtol=1e-4), "mismatch vs reference"
    print("KERNEL_OK")
</pallas_src>

<mosaic_0001>
module attributes {stable_mosaic.version = 11 : i64} {
  func.func @_shortcut_conv3x3_kernel(%arg0: i32, %arg1: memref<1x4x256xf32, #tpu.memory_space<vmem>>, %arg2: memref<4x36xf32, #tpu.memory_space<vmem>>, %arg3: memref<4x1xf32, #tpu.memory_space<vmem>>, %arg4: memref<1x4x256xf32, #tpu.memory_space<vmem>>, %arg5: memref<36x256xf32, #tpu.memory_space<vmem>>) attributes {dimension_semantics = [#tpu.dimension_semantics<parallel>], iteration_bounds = array<i64: 2>, scalar_prefetch = 0 : i64, scratch_operands = 1 : i64, tpu.core_type = #tpu.core_type<tc>, window_params = [{transform_indices = @transform_0, window_bounds = array<i64: 1, 4, 256>}, {pipeline_mode = #tpu.pipeline_mode<synchronous>, transform_indices = @transform_1, window_bounds = array<i64: 4, 36>}, {pipeline_mode = #tpu.pipeline_mode<synchronous>, transform_indices = @transform_2, window_bounds = array<i64: 4, 1>}, {transform_indices = @transform_3, window_bounds = array<i64: 1, 4, 256>}]} {
    %c0 = arith.constant 0 : index
    %c0_0 = arith.constant 0 : index
    %c0_1 = arith.constant 0 : index
    %0 = vector.load %arg1[%c0, %c0_0, %c0_1] : memref<1x4x256xf32, #tpu.memory_space<vmem>>, vector<1x4x256xf32>
    %1 = vector.shape_cast %0 : vector<1x4x256xf32> to vector<4x256xf32>
    %cst = arith.constant 0.000000e+00 : f32
    %2 = vector.broadcast %cst : f32 to vector<4x17xf32>
    %3 = tpu.concatenate %2, %1, %2 in 1 : vector<4x17xf32>, vector<4x256xf32>, vector<4x17xf32> -> vector<4x290xf32>
    %4 = tpu.iota {dimensions = array<i32: 1>} : vector<4x256xi32>
    %c16_i32 = arith.constant 16 : i32
    %c0_i32 = arith.constant 0 : i32
    %5 = arith.cmpi eq, %c16_i32, %c0_i32 : i32
    %c1_i32 = arith.constant 1 : i32
    %6 = arith.select %5, %c1_i32, %c16_i32 : i32
    %7 = vector.broadcast %6 : i32 to vector<4x256xi32>
    %8 = arith.remsi %4, %7 : vector<4x256xi32>
    %c0_i32_2 = arith.constant 0 : i32
    %9 = vector.broadcast %c0_i32_2 : i32 to vector<4x256xi32>
    %10 = arith.cmpi ne, %8, %9 : vector<4x256xi32>
    %c0_i32_3 = arith.constant 0 : i32
    %11 = vector.broadcast %c0_i32_3 : i32 to vector<4x256xi32>
    %12 = arith.cmpi slt, %8, %11 : vector<4x256xi32>
    %c0_i32_4 = arith.constant 0 : i32
    %13 = arith.cmpi slt, %6, %c0_i32_4 : i32
    %14 = vector.broadcast %13 : i1 to vector<4x256xi1>
    %15 = vector.broadcast %14 : vector<4x256xi1> to vector<4x256xi1>
    %16 = arith.xori %12, %15 : vector<4x256xi1>
    %17 = arith.andi %16, %10 : vector<4x256xi1>
    %18 = vector.broadcast %6 : i32 to vector<4x256xi32>
    %19 = arith.addi %8, %18 : vector<4x256xi32>
    %20 = arith.select %17, %19, %8 : vector<4x256xi1>, vector<4x256xi32>
    %c1_i32_5 = arith.constant 1 : i32
    %21 = vector.broadcast %c1_i32_5 : i32 to vector<4x256xi32>
    %22 = arith.cmpi sge, %20, %21 : vector<4x256xi32>
    %c14_i32 = arith.constant 14 : i32
    %23 = vector.broadcast %c14_i32 : i32 to vector<4x256xi32>
    %24 = arith.cmpi sle, %20, %23 : vector<4x256xi32>
    %25 = vector.extract_strided_slice %3 {offsets = [0, 0], sizes = [4, 256], strides = [1, 1]} : vector<4x290xf32> to vector<4x256xf32>
    %cst_6 = arith.constant 0.000000e+00 : f32
    %26 = vector.broadcast %cst_6 : f32 to vector<4x256xf32>
    %27 = arith.select %22, %25, %26 : vector<4x256xi1>, vector<4x256xf32>
    %c0_7 = arith.constant 0 : index
    %c0_8 = arith.constant 0 : index
    %28 = vector.load %arg5[%c0_7, %c0_8] : memref<36x256xf32, #tpu.memory_space<vmem>>, vector<4x256xf32>
    tpu.vector_store %arg5[%c0_7, %c0_8], %27 {strides = array<i32>} : memref<36x256xf32, #tpu.memory_space<vmem>>, vector<4x256xf32>,
    %29 = vector.extract_strided_slice %3 {offsets = [0, 1], sizes = [4, 256], strides = [1, 1]} : vector<4x290xf32> to vector<4x256xf32>
    %c4 = arith.constant 4 : index
    %c0_9 = arith.constant 0 : index
    %30 = vector.load %arg5[%c4, %c0_9] : memref<36x256xf32, #tpu.memory_space<vmem>>, vector<4x256xf32>
    tpu.vector_store %arg5[%c4, %c0_9], %29 {strides = array<i32>} : memref<36x256xf32, #tpu.memory_space<vmem>>, vector<4x256xf32>,
    %31 = vector.extract_strided_slice %3 {offsets = [0, 2], sizes = [4, 256], strides = [1, 1]} : vector<4x290xf32> to vector<4x256xf32>
    %cst_10 = arith.constant 0.000000e+00 : f32
    %32 = vector.broadcast %cst_10 : f32 to vector<4x256xf32>
    %33 = arith.select %24, %31, %32 : vector<4x256xi1>, vector<4x256xf32>
    %c8 = arith.constant 8 : index
    %c0_11 = arith.constant 0 : index
    %34 = vector.load %arg5[%c8, %c0_11] : memref<36x256xf32, #tpu.memory_space<vmem>>, vector<4x256xf32>
    tpu.vector_store %arg5[%c8, %c0_11], %33 {strides = array<i32>} : memref<36x256xf32, #tpu.memory_space<vmem>>, vector<4x256xf32>,
    %35 = vector.extract_strided_slice %3 {offsets = [0, 16], sizes = [4, 256], strides = [1, 1]} : vector<4x290xf32> to vector<4x256xf32>
    %cst_12 = arith.constant 0.000000e+00 : f32
    %36 = vector.broadcast %cst_12 : f32 to vector<4x256xf32>
    %37 = arith.select %22, %35, %36 : vector<4x256xi1>, vector<4x256xf32>
    %c12 = arith.constant 12 : index
    %c0_13 = arith.constant 0 : index
    %38 = vector.load %arg5[%c12, %c0_13] : memref<36x256xf32, #tpu.memory_space<vmem>>, vector<4x256xf32>
    tpu.vector_store %arg5[%c12, %c0_13], %37 {strides = array<i32>} : memref<36x256xf32, #tpu.memory_space<vmem>>, vector<4x256xf32>,
    %39 = vector.extract_strided_slice %3 {offsets = [0, 17], sizes = [4, 256], strides = [1, 1]} : vector<4x290xf32> to vector<4x256xf32>
    %c16 = arith.constant 16 : index
    %c0_14 = arith.constant 0 : index
    %40 = vector.load %arg5[%c16, %c0_14] : memref<36x256xf32, #tpu.memory_space<vmem>>, vector<4x256xf32>
    tpu.vector_store %arg5[%c16, %c0_14], %39 {strides = array<i32>} : memref<36x256xf32, #tpu.memory_space<vmem>>, vector<4x256xf32>,
    %41 = vector.extract_strided_slice %3 {offsets = [0, 18], sizes = [4, 256], strides = [1, 1]} : vector<4x290xf32> to vector<4x256xf32>
    %cst_15 = arith.constant 0.000000e+00 : f32
    %42 = vector.broadcast %cst_15 : f32 to vector<4x256xf32>
    %43 = arith.select %24, %41, %42 : vector<4x256xi1>, vector<4x256xf32>
    %c20 = arith.constant 20 : index
    %c0_16 = arith.constant 0 : index
    %44 = vector.load %arg5[%c20, %c0_16] : memref<36x256xf32, #tpu.memory_space<vmem>>, vector<4x256xf32>
    tpu.vector_store %arg5[%c20, %c0_16], %43 {strides = array<i32>} : memref<36x256xf32, #tpu.memory_space<vmem>>, vector<4x256xf32>,
    %45 = vector.extract_strided_slice %3 {offsets = [0, 32], sizes = [4, 256], strides = [1, 1]} : vector<4x290xf32> to vector<4x256xf32>
    %cst_17 = arith.constant 0.000000e+00 : f32
    %46 = vector.broadcast %cst_17 : f32 to vector<4x256xf32>
    %47 = arith.select %22, %45, %46 : vector<4x256xi1>, vector<4x256xf32>
    %c24 = arith.constant 24 : index
    %c0_18 = arith.constant 0 : index
    %48 = vector.load %arg5[%c24, %c0_18] : memref<36x256xf32, #tpu.memory_space<vmem>>, vector<4x256xf32>
    tpu.vector_store %arg5[%c24, %c0_18], %47 {strides = array<i32>} : memref<36x256xf32, #tpu.memory_space<vmem>>, vector<4x256xf32>,
    %49 = vector.extract_strided_slice %3 {offsets = [0, 33], sizes = [4, 256], strides = [1, 1]} : vector<4x290xf32> to vector<4x256xf32>
    %c28 = arith.constant 28 : index
    %c0_19 = arith.constant 0 : index
    %50 = vector.load %arg5[%c28, %c0_19] : memref<36x256xf32, #tpu.memory_space<vmem>>, vector<4x256xf32>
    tpu.vector_store %arg5[%c28, %c0_19], %49 {strides = array<i32>} : memref<36x256xf32, #tpu.memory_space<vmem>>, vector<4x256xf32>,
    %51 = vector.extract_strided_slice %3 {offsets = [0, 34], sizes = [4, 256], strides = [1, 1]} : vector<4x290xf32> to vector<4x256xf32>
    %cst_20 = arith.constant 0.000000e+00 : f32
    %52 = vector.broadcast %cst_20 : f32 to vector<4x256xf32>
    %53 = arith.select %24, %51, %52 : vector<4x256xi1>, vector<4x256xf32>
    %c32 = arith.constant 32 : index
    %c0_21 = arith.constant 0 : index
    %54 = vector.load %arg5[%c32, %c0_21] : memref<36x256xf32, #tpu.memory_space<vmem>>, vector<4x256xf32>
    tpu.vector_store %arg5[%c32, %c0_21], %53 {strides = array<i32>} : memref<36x256xf32, #tpu.memory_space<vmem>>, vector<4x256xf32>,
    %c0_22 = arith.constant 0 : index
    %c0_23 = arith.constant 0 : index
    %55 = vector.load %arg2[%c0_22, %c0_23] : memref<4x36xf32, #tpu.memory_space<vmem>>, vector<4x36xf32>
    %c0_24 = arith.constant 0 : index
    %c0_25 = arith.constant 0 : index
    %56 = vector.load %arg5[%c0_24, %c0_25] : memref<36x256xf32, #tpu.memory_space<vmem>>, vector<36x256xf32>
    %cst_26 = arith.constant dense<0.000000e+00> : vector<4x256xf32>
    %57 = tpu.matmul %55, %56, %cst_26 {dimension_numbers = #tpu.dot_dimension_numbers<[1], [0], [0], [1], [0, 0, 1, 1], [], []>} : vector<4x36xf32>, vector<36x256xf32>, vector<4x256xf32> -> vector<4x256xf32>
    %58 = arith.addf %1, %57 : vector<4x256xf32>
    %c0_27 = arith.constant 0 : index
    %c0_28 = arith.constant 0 : index
    %59 = vector.load %arg3[%c0_27, %c0_28] : memref<4x1xf32, #tpu.memory_space<vmem>>, vector<4x1xf32>
    %60 = vector.broadcast %59 : vector<4x1xf32> to vector<4x256xf32>
    %61 = arith.addf %58, %60 : vector<4x256xf32>
    %c0_29 = arith.constant 0 : index
    %c0_30 = arith.constant 0 : index
    %c0_31 = arith.constant 0 : index
    %62 = vector.load %arg4[%c0_29, %c0_30, %c0_31] : memref<1x4x256xf32, #tpu.memory_space<vmem>>, vector<1x4x256xf32>
    %63 = vector.shape_cast %62 : vector<1x4x256xf32> to vector<4x256xf32>
    %64 = vector.shape_cast %61 : vector<4x256xf32> to vector<1x4x256xf32>
    tpu.vector_store %arg4[%c0_29, %c0_30, %c0_31], %64 {strides = array<i32>} : memref<1x4x256xf32, #tpu.memory_space<vmem>>, vector<1x4x256xf32>,
    return
  }
  func.func @transform_0(%arg0: i32) -> (i32, i32, i32) {
    %c0_i32 = arith.constant 0 : i32
    %c0_i32_0 = arith.constant 0 : i32
    %c0_i32_1 = arith.constant 0 : i32
    return %arg0, %c0_i32, %c0_i32_0 : i32, i32, i32
  }
  func.func @transform_1(%arg0: i32) -> (i32, i32) {
    %c0_i32 = arith.constant 0 : i32
    %c0_i32_0 = arith.constant 0 : i32
    %c0_i32_1 = arith.constant 0 : i32
    return %c0_i32, %c0_i32_0 : i32, i32
  }
  func.func @transform_2(%arg0: i32) -> (i32, i32) {
    %c0_i32 = arith.constant 0 : i32
    %c0_i32_0 = arith.constant 0 : i32
    %c0_i32_1 = arith.constant 0 : i32
    return %c0_i32, %c0_i32_0 : i32, i32
  }
  func.func @transform_3(%arg0: i32) -> (i32, i32, i32) {
    %c0_i32 = arith.constant 0 : i32
    %c0_i32_0 = arith.constant 0 : i32
    %c0_i32_1 = arith.constant 0 : i32
    return %arg0, %c0_i32, %c0_i32_0 : i32, i32, i32
  }
}

</mosaic_0001>

<bundles_post_ra>
// kernel: tpu_custom_call.1
= control target key start
LH: loop header
LB: loop body
LE: loop exit
PB: predicated region body
PF: predicated region fallthrough
CT: control target
= control target key end

     0   :  { %8 = vsyncpa [#allocation4], 0  ;;  %s1025_s0 = inlined_call_operand.hbm [shape: f32[2,4,256], index: 0, kind: input, shape index: {}]   ;;  %s1026_s1 = inlined_call_operand.vmem [shape: f32[4,36], index: 1, kind: input, shape index: {}]   ;;  %s1027_s2 = inlined_call_operand.vmem [shape: f32[4,1], index: 2, kind: input, shape index: {}]   ;;  %s1028_s3 = inlined_call_operand.hbm [shape: f32[2,4,256], index: 3, kind: output, shape index: {}]  }
   0x1   :  { %10 = vsyncpa [#allocation4 + $0x1], 0 }
   0x2   :  { %11 = vsyncpa [#allocation5], 0 }
   0x3   :  { %13 = vsyncpa [#allocation5 + $0x1], 0  ;;  %s784_s12 = smov 0   ;;  %s786_s13 = smov 0  }
   0x4   :  { %s788_s14 = smov 0   ;;  %s790_s15 = smov 0  }
   0x5 LB: > { %s805_s16 = sadd.s32 4294967295, %s748_s15   ;;  %s565_s17 = sadd.s32 4294967294, %s748_s15   ;;  %s748_s15 = sphi %s790_s15, %s1051_s15   ;;  %s744_s14 = sphi %s788_s14, %s1050_s14   ;;  %s740_s13 = sphi %s786_s13, %s1049_s13   ;;  %s736_s12 = sphi %s784_s12, %s1048_s12  }
   0x6   : > { %s809_s18 = sadd.s32 1, %s748_s15   ;;  %s26_s19 = sadd.s32 1, %s744_s14 }
   0x7   : > { %s23_s20 = ssub.s32 %s748_s15, %s809_s18  ;;  %p33_p0 = scmp.ne.s32.totalorder %s744_s14, %s740_s13 }
   0x8   : > { %p24_p1 = scmp.eq.s32.totalorder %s23_s20, 0  ;;  %p34_p2 = scmp.eq.s32.totalorder %s748_s15, 0 }
   0x9   : > { %p39_p3 = scmp.ne.s32.totalorder %s740_s13, %s736_s12  ;;  %p40_p4 = scmp.eq.s32.totalorder %s805_s16, 0 }
   0xa   : > { %s821_s21 = scalar_select %p24_p1, %s744_s14, %s26_s19  }
   0xb   : > { %p823_p5 = por %p34_p2, %p33_p0  ;;  %p827_p6 = por %p40_p4, %p39_p3 }
   0xc   : > { %p105_p7 = scmp.eq.s32.totalorder %s805_s16, 1  ;;  %p111_p8 = scmp.eq.s32.totalorder %s565_s17, 1 }
   0xd   : > { %p604_p10 = scmp.lt.s32.totalorder %s748_s15, 2  ;;  %s137_s26 = sand.u32 1, %s744_s14  }
   0xe   : > { %p834_p11 = por %p105_p7, %p33_p0  ;;  %p838_p12 = por %p111_p8, %p39_p3 }
   0xf   : > { %s582_s27 = sshll.u32 %s748_s15, 7  ;;  %s568_s28 = sshll.u32 %s137_s26, 3 }
  0x10   : > { %s1032_s24 = scalar_select %p834_p11, 1, 0 }
  0x11   : > { %s1033_s25 = scalar_select %p838_p12, 1, 0 }
  0x12   : > { %s847_s4 = scalar_lea.hbm %s1025_s0, %s582_s27  ;;  %s141_s5 = scalar_lea.vmem [#allocation3], %s568_s28 }
  0x13   : > { %s149_s6 = sshll.u32 %s141_s5, 4  ;;  %p851_p13 = pnand %p604_p10, %p823_p5  ;;  %s855_s6 = int_to_ptr.vmem [resolvable:$true] %s149_s6 }
  0x14   : > { %s138_s8 = scalar_lea.sflag [#allocation4], %s137_s26  ;;  %s652_s9 = scalar_lea.hbm %s847_s4, 128 }
  0x15   : > { %p653_p2 = scmp.ne.s32.totalorder %s847_s4, %s652_s9  ;;  %p654_p3 = pneg %p851_p13 }
  0x16   : > { %s657_s17 = scalar_lea.hbm %s1025_s0, 256  ;;  %p658_p5 = scmp.lt.u32.totalorder %s847_s4, %s1025_s0 }
  0x17   : > { %p655_p4 = pnand %p654_p3, %p653_p2  ;;  %p659_p8 = scmp.lt.u32.totalorder %s657_s17, %s652_s9 }
  0x18   : > { %p661_p9 = scmp.lt.u32.totalorder %s652_s9, %s847_s4 }
  0x19   : > { %p656_p7 = pneg %p655_p4  ;;  %p660_p10 = por %p659_p8, %p658_p5 }
  0x1b   : > { %p662_p0 = por %p661_p9, %p660_p10 }
  0x1d   : > { %p663_p1 = pnand %p662_p0, %p656_p7 }
  0x1f   : > { %666 = shalt.err (!%p663_p1)
}
  0x20   : > { %s667_s22 = scalar_lea.vmem %s855_s6, 128  ;;  %s750_s26 = smov [#allocation3]  }
  0x21   : > { %p668_p2 = scmp.ne.s32.totalorder %s855_s6, %s667_s22  ;;  %s672_s27 = sshll.u32 %s750_s26, 4  ;;  %s673_s27 = int_to_ptr.vmem [resolvable:$false] %s672_s27 }
  0x22   : > { %s674_s28 = scalar_lea.vmem %s673_s27, 256  ;;  %p675_p11 = scmp.lt.s32.totalorder %s855_s6, %s673_s27 }
  0x23   : > { %p670_p4 = pnand %p668_p2, %p654_p3  ;;  %p676_p5 = scmp.lt.s32.totalorder %s674_s28, %s667_s22 }
  0x25   : > { %p671_p12 = pneg %p670_p4  ;;  %p677_p8 = por %p676_p5, %p675_p11 }
  0x27   : > { %p678_p9 = pnand %p677_p8, %p671_p12 }
  0x29   : > { %681 = shalt.err (!%p678_p9)
}
  0x2a   : > { %599 = dma.hbm_to_vmem [thread:$0]  (!%p851_p13), %s847_s4, 128, %s855_s6, %s138_s8  }
  0x2b   : > { %p1035_p0 = scmp.lt.s32.totalorder %s748_s15, 3  ;;  %p1036_p1 = scmp.ge.s32.totalorder %s748_s15, 1 }
  0x2d   : > { %p155_p3 = pnand %p1036_p1, %p1035_p0 }
  0x2e   : > { %s889_s29 = sand.u32 (!%p155_p3), 1, %s740_s13  }
  0x2f   : > { %158 = sbr.rel (%p155_p3) target bundleno = 579 (0x243), region = 32  ;;  %s572_s30 = sshll.u32 (!%p155_p3), %s889_s29, 3 }
  0x30   : > { %s161_s5 = scalar_lea.sflag (!%p155_p3), [#allocation4], %s889_s29  ;;  %s164_s7 = scalar_lea.vmem (!%p155_p3), [#allocation3], %s572_s30 }
  0x36   : > { %727 = dma.done.wait (%p827_p6), %s161_s5, 128  }
  0x37   : > { %729 = vsyncadd (%p827_p6), %s161_s5, 4294967168  ;;  %v899_v0 = vld [vmem:[%s164_s7] sm:$0xff]  ;;  %s751_s4 = smov 17   ;;  %v201_v2 = vlaneseq  ;;  %vm194_vm0 = vcmask 138240   ;;  %s752_s23 = smov 126   ;;  %v760_v19 = vmov 0.0  }
  0x38   : > { %190 = vrot.lane.b32.xlu0 %v899_v0, %s751_s4  ;;  %v189_v1 = vcombine.high %v899_v0, %v899_v0  ;;  %s753_s6 = smov 112   ;;  %s754_s8 = smov 110   ;;  %453 = vmatprep.mubr.f32.mxu0 %v760_v19  ;;  %v465_v20 = vld [vmem:[%s1027_s2] sm:$0xf]  ;;  %v761_v21 = vmov 0   ;;  %vm275_vm3 = vcmask 916480  }
  0x39   : > { %v905_v3 = vand.u32 127, %v201_v2  ;;  %s755_s9 = smov 96   ;;  %s756_s10 = smov 111   ;;  %650 = vset.pattern.permute.xlu0 %v761_v21  ;;  %vm260_vm4 = vcmask 1031168   ;;  %vm330_vm5 = vcmask 785408   ;;  %vm309_vm8 = vcmask 900096  }
  0x3a   : > { %s757_s11 = smov 127   ;;  %s758_s17 = smov 95   ;;  %vm296_vm9 = vcmask 908288   ;;  %vm247_vm10 = vcmask 1039360   ;;  %vm345_vm11 = vcmask 777216   ;;  %vm358_vm12 = vcmask 769024  }
  0x3b   : > { %v208_v4 = vand.u32 15, %v905_v3  ;;  %v909_v5 = vadd.s32 128, %v905_v3  ;;  %s759_s19 = smov 94   ;;  %vm382_vm13 = vcmask 1043456   ;;  %vm378_vm14 = vcmask 293888   ;;  %s583_s28 = sshll.u32 %s805_s16, 7 }
  0x3c   : > { %192 = vrot.lane.b32.xlu0 %v189_v1, %s751_s4  ;;  %s186_s5 = scalar_lea.vmem [#allocation6], %s572_s30  ;;  %p1045_p11 = scmp.ne.s32.totalorder %s1032_s24, 0 }
  0x3d   : > { %vm913_vm1 = vcmp.ge.s32.totalorder %v208_v4, 1  ;;  %v215_v7 = vand.u32 15, %v909_v5  ;;  %vm940_vm6 = vcmp.le.s32.totalorder %v208_v4, 14  ;;  %s495_s7 = sshll.u32 %s186_s5, 4  ;;  %s763_s16 = smov [#allocation6]   ;;  %s983_s7 = int_to_ptr.vmem [resolvable:$true] %s495_s7 }
  0x3e   : > { %s686_s30 = sshll.u32 %s763_s16, 4  ;;  %s687_s30 = int_to_ptr.vmem [resolvable:$false] %s686_s30 }
  0x3f   : > { %vm923_vm2 = vcmp.ge.s32.totalorder %v215_v7, 1  ;;  %vm946_vm7 = vcmp.le.s32.totalorder %v215_v7, 14  ;;  %p689_p7 = scmp.lt.s32.totalorder %s983_s7, %s687_s30 }
  0xaa   : > { %v191_v8 = vpop.permute.xlu0 %190 }
  0xab   : > { %v199_v9 = vsel %vm194_vm0, 0.0, %v191_v8 }
  0xac   : > { %254 = vrot.lane.b32.xlu1 %v199_v9, %s752_s23  ;;  %269 = vrot.lane.b32.xlu0 %v199_v9, %s753_s6  ;;  %v232_v10 = vsel %vm913_vm1, %v199_v9, 0.0  ;;  %v238_v16 = vrot.slane %v199_v9, 4 }
  0xad   : > { %234 = vst [vmem:[#allocation2] sm:$0xf] %v232_v10 }
  0xae   : > { %v193_v12 = vpop.permute.xlu0 %192 }
  0xaf   : > { %v195_v13 = vsel %vm194_vm0, %v191_v8, %v193_v12  ;;  %v200_v15 = vsel %vm194_vm0, %v193_v12, 0.0 }
  0xb0   : > { %303 = vrot.lane.b32.xlu1 %v199_v9, %s754_s8  ;;  %324 = vrot.lane.b32.xlu0 %v199_v9, %s755_s9  ;;  %v233_v14 = vsel %vm923_vm2, %v195_v13, 0.0  ;;  %v240_v17 = vrot.slane %v200_v15, 4  ;;  %v239_v18 = vrot.slane %v195_v13, 4 }
  0xb1   : > { %235 = vst [vmem:[#allocation2 + $0x8] sm:$0xf] %v233_v14 }
  0xb4   : > { %290 = vrot.lane.b32.xlu1 %v199_v9, %s756_s10  ;;  %258 = vrot.lane.b32.xlu0 %v200_v15, %s752_s23 }
  0xb8   : > { %241 = vrot.lane.b32.xlu0 %v238_v16, %s757_s11  ;;  %271 = vrot.lane.b32.xlu1 %v195_v13, %s753_s6 }
  0xbc   : > { %307 = vrot.lane.b32.xlu0 %v200_v15, %s754_s8  ;;  %273 = vrot.lane.b32.xlu1 %v200_v15, %s753_s6  ;;  %s981_s6 = scalar_lea.hbm %s1028_s3, %s583_s28 }
  0xc0   : > { %326 = vrot.lane.b32.xlu0 %v195_v13, %s755_s9  ;;  %256 = vrot.lane.b32.xlu1 %v195_v13, %s752_s23 }
  0xc4   : > { %292 = vrot.lane.b32.xlu0 %v195_v13, %s756_s10  ;;  %305 = vrot.lane.b32.xlu1 %v195_v13, %s754_s8  ;;  %s481_s8 = scalar_lea.sflag [#allocation5], %s889_s29 }
  0xc8   : > { %245 = vrot.lane.b32.xlu0 %v240_v17, %s757_s11  ;;  %328 = vrot.lane.b32.xlu1 %v200_v15, %s755_s9  ;;  %s682_s9 = scalar_lea.vmem %s983_s7, 128 }
  0xc9   : > { %p683_p6 = scmp.ne.s32.totalorder %s983_s7, %s682_s9 }
  0xcb   : > { %p684_p12 = pnand %p683_p6, %p1045_p11 }
  0xcc   : > { %343 = vrot.lane.b32.xlu0 %v240_v17, %s758_s17  ;;  %294 = vrot.lane.b32.xlu1 %v200_v15, %s756_s10  ;;  %s688_s10 = scalar_lea.vmem %s687_s30, 256 }
  0xcd   : > { %p685_p13 = pneg %p684_p12  ;;  %p690_p10 = scmp.lt.s32.totalorder %s688_s10, %s682_s9 }
  0xcf   : > { %p691_p2 = por %p690_p10, %p689_p7 }
  0xd0   : > { %339 = vrot.lane.b32.xlu0 %v238_v16, %s758_s17  ;;  %243 = vrot.lane.b32.xlu1 %v239_v18, %s757_s11 }
  0xd1   : > { %p692_p4 = pnand %p691_p2, %p685_p13 }
  0xd4   : > { %356 = vrot.lane.b32.xlu0 %v200_v15, %s759_s19  ;;  %341 = vrot.lane.b32.xlu1 %v239_v18, %s758_s17 }
  0xd8   : > { %354 = vrot.lane.b32.xlu1 %v195_v13, %s759_s19  ;;  %468 = vperm.xlu0 %650, %v465_v20  }
  0xdc   : > { %352 = vrot.lane.b32.xlu1 %v199_v9, %s759_s19 }
 0x11e   : > { %v255_v22 = vpop.permute.xlu1 %254  ;;  %v270_v23 = vpop.permute.xlu0 %269 }
 0x122   : > { %v304_v24 = vpop.permute.xlu1 %303  ;;  %v325_v25 = vpop.permute.xlu0 %324 }
 0x126   : > { %v291_v26 = vpop.permute.xlu1 %290  ;;  %v259_v27 = vpop.permute.xlu0 %258 }
 0x12a   : > { %v272_v28 = vpop.permute.xlu1 %271  ;;  %v242_v29 = vpop.permute.xlu0 %241 }
 0x12b   : > { %v276_v30 = vsel %vm275_vm3, %v270_v23, %v272_v28 }
 0x12c   : > { %v280_v31 = vsel %vm913_vm1, %v276_v30, 0.0 }
 0x12d   : > { %v284_v32 = vrot.slane %v280_v31, 4  ;;  %v762_v31 = vmov 839922192  }
 0x12e   : > { %v274_v33 = vpop.permute.xlu1 %273  ;;  %v308_v34 = vpop.permute.xlu0 %307 }
 0x12f   : > { %288 = vst [vmem:[#allocation2 + $0x10] sm:$0xf0] %v284_v32  ;;  %v277_v35 = vsel %vm275_vm3, %v272_v28, %v274_v33  ;;  %v471_v32 = vunpack.c.l.s4 %v762_v31 }
 0x130   : > { %v281_v36 = vsel %vm923_vm2, %v277_v35, 0.0 }
 0x131   : > { %v285_v37 = vrot.slane %v281_v36, 4  ;;  %v472_v33 = vunpack.c.0.s8 %v471_v32 }
 0x132   : > { %v257_v40 = vpop.permute.xlu1 %256  ;;  %v327_v41 = vpop.permute.xlu0 %326 }
 0x133   : > { %289 = vst [vmem:[#allocation2 + $0x18] sm:$0xf0] %v285_v37  ;;  %v261_v42 = vsel %vm260_vm4, %v255_v22, %v257_v40  ;;  %v262_v43 = vsel %vm260_vm4, %v257_v40, %v259_v27  ;;  %v331_v44 = vsel %vm330_vm5, %v325_v25, %v327_v41 }
 0x134   : > { %v265_v45 = vsel %vm940_vm6, %v261_v42, 0.0  ;;  %v266_v46 = vsel %vm946_vm7, %v262_v43, 0.0  ;;  %v335_v47 = vsel %vm913_vm1, %v331_v44, 0.0 }
 0x135   : > { %267 = vst [vmem:[#allocation2 + $0x10] sm:$0xf] %v265_v45  ;;  %268 = vst [vmem:[#allocation2 + $0x18] sm:$0xf] %v266_v46 }
 0x136   : > { %337 = vst [vmem:[#allocation2 + $0x30] sm:$0xf] %v335_v47  ;;  %v306_v48 = vpop.permute.xlu1 %305  ;;  %v293_v49 = vpop.permute.xlu0 %292 }
 0x137   : > { %v310_v50 = vsel %vm309_vm8, %v304_v24, %v306_v48  ;;  %v311_v51 = vsel %vm309_vm8, %v306_v48, %v308_v34  ;;  %v297_v52 = vsel %vm296_vm9, %v291_v26, %v293_v49  ;;  %v474_v34 = vshrl.u32 %v201_v2, 7 }
 0x138   : > { %v314_v53 = vsel %vm940_vm6, %v310_v50, 0.0  ;;  %v315_v54 = vsel %vm946_vm7, %v311_v51, 0.0  ;;  %301 = vst [vmem:[#allocation2 + $0x20] sm:$0xf] %v297_v52 }
 0x139   : > { %v318_v55 = vrot.slane %v314_v53, 4  ;;  %v319_v56 = vrot.slane %v315_v54, 4  ;;  %v475_v35 = vsub.s32 %v472_v33, %v474_v34 }
 0x13a   : > { %v329_v57 = vpop.permute.xlu1 %328  ;;  %v246_v58 = vpop.permute.xlu0 %245 }
 0x13b   : > { %322 = vst [vmem:[#allocation2 + $0x20] sm:$0xf0] %v318_v55  ;;  %323 = vst [vmem:[#allocation2 + $0x28] sm:$0xf0] %v319_v56  ;;  %v332_v59 = vsel %vm330_vm5, %v327_v41, %v329_v57 }
 0x13c   : > { %v336_v60 = vsel %vm923_vm2, %v332_v59, 0.0  ;;  %v371_v11 = vld [vmem:[#allocation2 + $0x18] sm:$0xff]  ;;  %v370_v15 = vld [vmem:[#allocation2 + $0x10] sm:$0xff] }
 0x13d   : > { %338 = vst [vmem:[#allocation2 + $0x38] sm:$0xf] %v336_v60 }
 0x13e   : > { %v295_v61 = vpop.permute.xlu1 %294  ;;  %v344_v62 = vpop.permute.xlu0 %343 }
 0x13f   : > { %v298_v63 = vsel %vm296_vm9, %v293_v49, %v295_v61 }
 0x140   : > { %302 = vst [vmem:[#allocation2 + $0x28] sm:$0xf] %v298_v63 }
 0x142   : > { %v244_v1 = vpop.permute.xlu1 %243  ;;  %v340_v5 = vpop.permute.xlu0 %339  ;;  %v372_v20 = vld [vmem:[#allocation2 + $0x20] sm:$0xff] }
 0x143   : > { %v248_v3 = vsel %vm247_vm10, %v242_v29, %v244_v1  ;;  %v249_v4 = vsel %vm247_vm10, %v244_v1, %v246_v58  ;;  %v367_v29 = vld [vmem:[%s1026_s1] sm:$0xf] }
 0x144   : > { %252 = vst [vmem:[#allocation2] sm:$0xf0] %v248_v3  ;;  %253 = vst [vmem:[#allocation2 + $0x8] sm:$0xf0] %v249_v4 }
 0x146   : > { %v342_v6 = vpop.permute.xlu1 %341  ;;  %v357_v9 = vpop.permute.xlu0 %356 }
 0x147   : > { %v346_v7 = vsel %vm345_vm11, %v340_v5, %v342_v6  ;;  %v347_v8 = vsel %vm345_vm11, %v342_v6, %v344_v62  ;;  %v373_v22 = vld [vmem:[#allocation2 + $0x28] sm:$0xff] }
 0x148   : > { %350 = vst [vmem:[#allocation2 + $0x30] sm:$0xf0] %v346_v7  ;;  %351 = vst [vmem:[#allocation2 + $0x38] sm:$0xf0] %v347_v8 }
 0x14a   : > { %v355_v10 = vpop.permute.xlu1 %354 }
 0x14b   : > { %v360_v12 = vsel %vm358_vm12, %v355_v10, %v357_v9  ;;  %v369_v13 = vld [vmem:[#allocation2 + $0x8] sm:$0xff]  ;;  %v368_v14 = vld [vmem:[#allocation2] sm:$0xff] }
 0x14c   : > { %v364_v16 = vsel %vm946_vm7, %v360_v12, 0.0  ;;  %v584_v17 = vpack.c.bf16 %v371_v11, %v369_v13  ;;  %v586_v18 = vpack.c.bf16 %v370_v15, %v368_v14 }
 0x14d   : > { %366 = vst [vmem:[#allocation2 + $0x48] sm:$0xf] %v364_v16 }
 0x14e   : > { %v353_v19 = vpop.permute.xlu1 %352  ;;  %585 = vmatprep.subr.bf16.mxu0 %v584_v17 }
 0x14f   : > { %v359_v21 = vsel %vm358_vm12, %v353_v19, %v355_v10  ;;  %587 = vmatpush1.bf16.msra.mxu0 %v586_v18  ;;  %v375_v23 = vld [vmem:[#allocation2 + $0x38] sm:$0xff]  ;;  %v374_v24 = vld [vmem:[#allocation2 + $0x30] sm:$0xff] }
 0x150   : > { %v363_v25 = vsel %vm940_vm6, %v359_v21, 0.0  ;;  %v588_v26 = vpack.c.bf16 %v375_v23, %v373_v22  ;;  %v590_v27 = vpack.c.bf16 %v374_v24, %v372_v20 }
 0x151   : > { %365 = vst [vmem:[#allocation2 + $0x40] sm:$0xf] %v363_v25 }
 0x152   : > { %589 = vmatprep.subr.bf16.mxu0 %v588_v26 }
 0x153   : > { %591 = vmatpush1.bf16.msra.mxu0 %v590_v27 }
 0x154   : > { %v377_v28 = vld [vmem:[#allocation2 + $0x48] sm:$0xf] }
 0x155   : > { %574 = vmatprep.subr.msk.mxu0 %vm382_vm13, %v377_v28 }
 0x157   : > { %v469_v36 = vpop.permute.xlu0 %468 }
 0x158   : > { %v376_v30 = vld [vmem:[#allocation2 + $0x40] sm:$0xf]  ;;  %v476_v40 = vrot.slane %v469_v36, %v475_v35 }
 0x159   : > { %575 = vmatpush1.msk.msra.mxu0 %vm382_vm13, %v376_v30 }
 0x15a   : > { %576 = vmatmul.mubr.msk.f32.vlgmr.msra.gmra.mrb[0].mxu0 %vm378_vm14, %v367_v29 }
 0x22d   : > { %v455_v37 = vpop.f32.mrb[0].mxu0 }
 0x22e   : > { %v457_v38 = vpop.f32.mrb[1].mxu0 }
 0x22f   : > { %v462_v39 = vcombine.low %v455_v37, %v457_v38 }
 0x231   : > { %v464_v41 = vadd.f32 %v462_v39, %v899_v0 }
 0x233   : > { %v478_v42 = vadd.f32 %v476_v40, %v464_v41 }
 0x235   : > { %479 = vst [vmem:[%s186_s5] sm:$0xff] %v478_v42 }
 0x236   : > { %695 = shalt.err (!%p692_p4)
}
 0x237   : > { %s696_s29 = scalar_lea.hbm %s981_s6, 128  ;;  %s700_s19 = scalar_lea.hbm %s1028_s3, 256 }
 0x238   : > { %p697_p5 = scmp.ne.s32.totalorder %s981_s6, %s696_s29  ;;  %p701_p0 = scmp.lt.u32.totalorder %s981_s6, %s1028_s3 }
 0x239   : > { %p702_p1 = scmp.lt.u32.totalorder %s700_s19, %s696_s29  ;;  %p704_p6 = scmp.lt.u32.totalorder %s696_s29, %s981_s6 }
 0x23a   : > { %p698_p8 = pnand %p697_p5, %p1045_p11 }
 0x23b   : > { %p703_p3 = por %p702_p1, %p701_p0 }
 0x23c   : > { %p699_p9 = pneg %p698_p8 }
 0x23d   : > { %p705_p12 = por %p704_p6, %p703_p3 }
 0x23f   : > { %p706_p13 = pnand %p705_p12, %p699_p9 }
 0x241   : > { %709 = shalt.err (!%p706_p13)
}
 0x242   : > { %594 = dma.vmem_to_hbm [thread:$0]  (%p1045_p11), %s983_s7, 128, %s981_s6, %s481_s8  }
 0x243 PF: > { %s507_s26 = sand.u32 1, %s736_s12   ;;  %p1046_p7 = scmp.ne.s32.totalorder %s1033_s25, 0 }
 0x244   : > { %p1047_p10 = scmp.ge.s32.totalorder %s748_s15, 2  ;;  %s508_s27 = scalar_lea.sflag [#allocation5], %s507_s26 }
 0x246   : > { %p601_p2 = pnand %p1047_p10, %p1046_p7 }
 0x248   : > { %731 = dma.done.wait (!%p601_p2), %s508_s27, 128  }
 0x249   : > { %733 = vsyncadd (!%p601_p2), %s508_s27, 4294967168  ;;  %p16_p4 = scmp.ge.s32.totalorder %s809_s18, 4   ;;  %s1048_s12 = smov %s740_s13 }
 0x24a   : > { %s1049_s13 = smov %s744_s14  ;;  %s1050_s14 = smov %s821_s21 }
 0x24b   : > { %s1051_s15 = smov %s809_s18  ;;  %18 = sbr.rel (!%p16_p4) target bundleno = 5 (0x5), region = 77 }
 0x252   :  { %513 = vsyncpa [#allocation4], 1 }
 0x253   :  { %515 = vsyncpa [#allocation4 + $0x1], 1 }
 0x254   :  { %516 = vsyncpa [#allocation5], 1 }
 0x255   :  { %518 = vsyncpa [#allocation5 + $0x1], 1 }

</bundles_post_ra>
